<compile_context>
chip_gen: v5e
topology: v5e:2x2
jax: 0.10.0
libtpu: 0.0.40
codegen_flags: <defaults>
</compile_context>

<pallas_src>
import jax
import jax.numpy as jnp
from jax import lax
from jax.experimental import pallas as pl
from jax.experimental.pallas import tpu as pltpu


def _downsample_kernel(xc_ref, xh_ref, w_ref, b_ref, o_ref):
    # xc_ref: (1, TH, WO, 4C)  current strip of the space-to-depth input
    #         lane groups (p-major): [g00 | g01 | g10 | g11], g = (row parity p, col parity q)
    # xh_ref: (1, 1,  WO, 4C)  last row of the previous strip (top halo; zeroed for strip 0)
    # w_ref : (9C, C)          packed conv weight (only the 9 non-zero Cin groups)
    # b_ref : (1, C)           conv bias (f32)
    # o_ref : (1, TH, WO, C)   output strip
    C = o_ref.shape[-1]
    TH, WO = xc_ref.shape[1], xc_ref.shape[2]
    M = TH * WO
    f32 = jnp.float32

    s = pl.program_id(1)

    xc = xc_ref[0]                                   # (TH, WO, 4C), native dtype
    halo = xh_ref[0]                                 # (1, WO, 4C)
    halo = halo * (s > 0).astype(halo.dtype)         # strip 0: top row is conv zero-padding

    def colshift(v):
        # out[:, j, :] = v[:, j-1, :];  out[:, 0, :] = 0   (left zero-padding column)
        r = pltpu.roll(v, shift=1, axis=1)           # sublane rotation (XLU)
        col = lax.broadcasted_iota(jnp.int32, v.shape, 1)
        return jnp.where(col == 0, jnp.zeros_like(r), r)

    # Row-shifted (top-halo) view of the p=1 channel groups [g10 | g11] = lanes [2C, 4C).
    halo_p1 = halo[:, :, 2 * C:]                     # (1, WO, 2C)
    if TH > 1:
        p1 = jnp.concatenate([halo_p1, xc[: TH - 1, :, 2 * C:]], axis=0)   # (TH, WO, 2C)
    else:
        p1 = halo_p1

    # Five MXU dots over the non-zero Cin groups only (total K = 9C), f32 accumulate.
    # V11 (a=1,b=1): all 4 groups, no shift, K = 4C   -> taps (1,1),(1,2),(2,1),(2,2)
    acc = jnp.dot(xc.reshape(M, 4 * C), w_ref[0:4 * C, :],
                  preferred_element_type=f32)
    # V01 (a=0,b=1): p=1 groups, row-shifted, K = 2C  -> taps (0,1),(0,2)
    acc += jnp.dot(p1.reshape(M, 2 * C), w_ref[4 * C:6 * C, :],
                   preferred_element_type=f32)
    # V10 (a=1,b=0): q=1 groups, col-shifted, 2 x K = C -> taps (1,0),(2,0)
    acc += jnp.dot(colshift(xc[:, :, C:2 * C]).reshape(M, C),
                   w_ref[6 * C:7 * C, :], preferred_element_type=f32)
    acc += jnp.dot(colshift(xc[:, :, 3 * C:4 * C]).reshape(M, C),
                   w_ref[7 * C:8 * C, :], preferred_element_type=f32)
    # V00 (a=0,b=0): g11 row+col shifted (reuses p1), K = C -> tap (0,0)
    acc += jnp.dot(colshift(p1[:, :, C:2 * C]).reshape(M, C),
                   w_ref[8 * C:9 * C, :], preferred_element_type=f32)

    acc = acc + b_ref[...].astype(f32)               # (M, C) + (1, C)
    o_ref[...] = acc.reshape(o_ref.shape).astype(o_ref.dtype)


def _pack_weight(w, dtype):
    """(Cout, Cin, 3, 3) OIHW conv weight -> (9*Cin, Cout) packed matmul weight.

    Row-group order matches the five dots in _downsample_kernel (only the 9
    non-zero (group, tap) pairs are kept; the 7 structurally-zero groups of the
    old 16C packing are dropped).
    """
    wt = jnp.transpose(w, (1, 0, 2, 3))              # (Cin, Cout, kh, kw)
    taps = [(1, 1), (1, 2), (2, 1), (2, 2),          # V11: groups g00, g01, g10, g11
            (0, 1), (0, 2),                          # V01: groups g10, g11 (row-shifted)
            (1, 0),                                  # V10a: g01 (col-shifted)
            (2, 0),                                  # V10b: g11 (col-shifted)
            (0, 0)]                                  # V00 : g11 (row+col shifted)
    return jnp.concatenate([wt[:, :, kh, kw] for kh, kw in taps], axis=0).astype(dtype)


def downsample_forward(x, temb, weight, bias):
    """x: (B, C, H, W) NCHW, weight: (C, C, 3, 3) OIHW, bias: (C,).

    temb is unused (matches the PyTorch DownSample.forward signature).
    """
    del temb
    B, C, H, W = x.shape
    # Odd H/W: the stride-2 / pad-1 conv only ever reads one extra zero row/col at
    # the bottom/right; add it explicitly so the space-to-depth path applies.
    pad_h, pad_w = H % 2, W % 2
    if pad_h or pad_w:
        x = jnp.pad(x, ((0, 0), (0, 0), (0, pad_h), (0, pad_w)))
        H, W = H + pad_h, W + pad_w
    HO, WO = H // 2, W // 2

    # Single fused XLA pass: NCHW -> space-to-depth channels-last (B, HO, WO, 4C),
    # lane order [p=0 q=0 | p=0 q=1 | p=1 q=0 | p=1 q=1] each C wide.
    x4 = (x.reshape(B, C, HO, 2, WO, 2)
            .transpose(0, 2, 4, 3, 5, 1)
            .reshape(B, HO, WO, 4 * C))

    w_packed = _pack_weight(weight, x.dtype)          # (9C, C), native dtype
    b2 = bias.reshape(1, C).astype(jnp.float32)

    # --- strip (tile) sizing from the queried VMEM capacity -------------------
    itemsize = x.dtype.itemsize
    try:
        vmem_cap = int(pltpu.get_tpu_info().vmem_capacity_bytes)   # 64 MiB v7x, 128 MiB v5e/v6e
    except Exception:
        vmem_cap = 64 * 1024 * 1024
    row_bytes = WO * 4 * C * itemsize
    target_rows = max(1, (vmem_cap // 32) // max(row_bytes, 1))     # ~2-4 MiB input strip
    if B == 1:
        # Keep at least two strips so the second v7x TensorCore gets work.
        target_rows = min(target_rows, max(1, HO // 2))
    if HO <= target_rows:
        TH = HO
    else:
        TH = 1
        for t in range(min(target_rows, HO), 0, -1):
            if HO % t == 0:
                TH = t
                break
    NS = HO // TH

    # --- scoped-VMEM budget and cost hint --------------------------------------
    in_blk = TH * WO * 4 * C * itemsize
    out_blk = TH * WO * C * itemsize
    halo_blk = WO * 4 * C * itemsize
    need = 2 * (in_blk + out_blk + halo_blk) + 9 * C * C * itemsize \
        + 3 * in_blk + TH * WO * C * 4                # temporaries + f32 accumulator
    vmem_limit = int(min(max(2 * need, 32 * 1024 * 1024), vmem_cap * 7 // 8))

    flops = 2 * B * HO * WO * 9 * C * C
    bytes_accessed = int((B * HO * WO * 4 * C + B * NS * WO * 4 * C
                          + 9 * C * C) * itemsize + 4 * C
                         + B * HO * WO * C * itemsize)

    out_nhwc = pl.pallas_call(
        _downsample_kernel,
        out_shape=jax.ShapeDtypeStruct((B, HO, WO, C), x.dtype),
        grid=(B, NS),
        in_specs=[
            # current strip
            pl.BlockSpec((1, TH, WO, 4 * C), lambda b, s: (b, s, 0, 0)),
            # top-halo row: last row of the previous strip (block size 1 => element index);
            # clamped to row 0 for s == 0 and zeroed inside the kernel.
            pl.BlockSpec((1, 1, WO, 4 * C),
                         lambda b, s: (b, jnp.maximum(s * TH - 1, 0), 0, 0)),
            pl.BlockSpec((9 * C, C), lambda b, s: (0, 0)),
            pl.BlockSpec((1, C), lambda b, s: (0, 0)),
        ],
        out_specs=pl.BlockSpec((1, TH, WO, C), lambda b, s: (b, s, 0, 0)),
        compiler_params=pltpu.CompilerParams(
            dimension_semantics=("parallel", "parallel"),
            vmem_limit_bytes=vmem_limit),
        cost_estimate=pl.CostEstimate(flops=flops, transcendentals=0,
                                      bytes_accessed=bytes_accessed),
    )(x4, x4, w_packed, b2)

    # NHWC -> NCHW to match the PyTorch module's output layout (required by the
    # module contract; single XLA pass over the 4x-smaller output).
    return jnp.transpose(out_nhwc, (0, 3, 1, 2))


if __name__ == "__main__":
    B, C, H, W = 2, 4, 16, 16
    key = jax.random.PRNGKey(0)
    kx, kw, kt = jax.random.split(key, 3)

    x = jax.random.normal(kx, (B, C, H, W), jnp.float32)
    temb = jax.random.normal(kt, (B, 32), jnp.float32)    # unused by DownSample

    # nn.Conv2d(in_ch, in_ch, 3, stride=2, padding=1): xavier_uniform_ weight,
    # zero bias (DownSample.initialize()).
    fan = C * 3 * 3
    bound = float((6.0 / (fan + fan)) ** 0.5)
    weight = jax.random.uniform(kw, (C, C, 3, 3), jnp.float32, -bound, bound)
    bias = jnp.zeros((C,), jnp.float32)

    out = jax.jit(downsample_forward)(x, temb, weight, bias)
    out = jax.block_until_ready(out)
    assert out.shape == (B, C, H // 2, W // 2), out.shape
    assert bool(jnp.all(jnp.isfinite(out)))

    # Numerical check against XLA's strided conv.
    ref = jax.lax.conv_general_dilated(
        x, weight, window_strides=(2, 2), padding=((1, 1), (1, 1)),
        dimension_numbers=("NCHW", "OIHW", "NCHW")) + bias[None, :, None, None]
    max_err = float(jnp.max(jnp.abs(out - ref)))
    assert bool(jnp.allclose(out, ref, atol=1e-4, rtol=1e-4)), max_err

    print("KERNEL_OK")
</pallas_src>

<mosaic_0001>
module attributes {stable_mosaic.version = 11 : i64} {
  func.func @_downsample_kernel(%arg0: i32, %arg1: i32, %arg2: memref<1x8x8x16xf32, #tpu.memory_space<vmem>>, %arg3: memref<1x1x8x16xf32, #tpu.memory_space<vmem>>, %arg4: memref<36x4xf32, #tpu.memory_space<vmem>>, %arg5: memref<1x4xf32, #tpu.memory_space<vmem>>, %arg6: memref<1x8x8x4xf32, #tpu.memory_space<vmem>>) attributes {dimension_semantics = [#tpu.dimension_semantics<parallel>, #tpu.dimension_semantics<parallel>], iteration_bounds = array<i64: 2, 1>, scalar_prefetch = 0 : i64, scratch_operands = 0 : i64, tpu.core_type = #tpu.core_type<tc>, window_params = [{transform_indices = @transform_0, window_bounds = array<i64: 1, 8, 8, 16>}, {transform_indices = @transform_1, window_bounds = array<i64: 1, 1, 8, 16>}, {pipeline_mode = #tpu.pipeline_mode<synchronous>, transform_indices = @transform_2, window_bounds = array<i64: 36, 4>}, {pipeline_mode = #tpu.pipeline_mode<synchronous>, transform_indices = @transform_3, window_bounds = array<i64: 1, 4>}, {transform_indices = @transform_4, window_bounds = array<i64: 1, 8, 8, 4>}]} {
    %c0 = arith.constant 0 : index
    %c0_0 = arith.constant 0 : index
    %c0_1 = arith.constant 0 : index
    %c0_2 = arith.constant 0 : index
    %0 = vector.load %arg2[%c0, %c0_0, %c0_1, %c0_2] : memref<1x8x8x16xf32, #tpu.memory_space<vmem>>, vector<1x8x8x16xf32>
    %1 = vector.shape_cast %0 : vector<1x8x8x16xf32> to vector<8x8x16xf32>
    %c0_3 = arith.constant 0 : index
    %c0_4 = arith.constant 0 : index
    %c0_5 = arith.constant 0 : index
    %c0_6 = arith.constant 0 : index
    %2 = vector.load %arg3[%c0_3, %c0_4, %c0_5, %c0_6] : memref<1x1x8x16xf32, #tpu.memory_space<vmem>>, vector<1x1x8x16xf32>
    %3 = vector.shape_cast %2 : vector<1x1x8x16xf32> to vector<1x8x16xf32>
    %c0_i32 = arith.constant 0 : i32
    %4 = arith.cmpi sgt, %arg1, %c0_i32 : i32
    %5 = arith.extui %4 : i1 to i32
    %6 = arith.sitofp %5 : i32 to f32
    %7 = vector.broadcast %6 : f32 to vector<1x8x16xf32>
    %8 = arith.mulf %3, %7 : vector<1x8x16xf32>
    %9 = vector.extract_strided_slice %8 {offsets = [0, 0, 8], sizes = [1, 8, 8], strides = [1, 1, 1]} : vector<1x8x16xf32> to vector<1x8x8xf32>
    %10 = vector.extract_strided_slice %1 {offsets = [0, 0, 8], sizes = [7, 8, 8], strides = [1, 1, 1]} : vector<8x8x16xf32> to vector<7x8x8xf32>
    %11 = tpu.concatenate %9, %10 in 0 : vector<1x8x8xf32>, vector<7x8x8xf32> -> vector<8x8x8xf32>
    %12 = vector.shape_cast %1 : vector<8x8x16xf32> to vector<64x16xf32>
    %c0_7 = arith.constant 0 : index
    %c0_8 = arith.constant 0 : index
    %13 = vector.load %arg4[%c0_7, %c0_8] : memref<36x4xf32, #tpu.memory_space<vmem>>, vector<16x4xf32>
    %cst = arith.constant dense<0.000000e+00> : vector<64x4xf32>
    %14 = tpu.matmul %12, %13, %cst {dimension_numbers = #tpu.dot_dimension_numbers<[1], [0], [0], [1], [0, 0, 1, 1], [], []>} : vector<64x16xf32>, vector<16x4xf32>, vector<64x4xf32> -> vector<64x4xf32>
    %15 = vector.shape_cast %11 : vector<8x8x8xf32> to vector<64x8xf32>
    %c16 = arith.constant 16 : index
    %c0_9 = arith.constant 0 : index
    %16 = vector.load %arg4[%c16, %c0_9] : memref<36x4xf32, #tpu.memory_space<vmem>>, vector<8x4xf32>
    %cst_10 = arith.constant dense<0.000000e+00> : vector<64x4xf32>
    %17 = tpu.matmul %15, %16, %cst_10 {dimension_numbers = #tpu.dot_dimension_numbers<[1], [0], [0], [1], [0, 0, 1, 1], [], []>} : vector<64x8xf32>, vector<8x4xf32>, vector<64x4xf32> -> vector<64x4xf32>
    %18 = arith.addf %14, %17 : vector<64x4xf32>
    %19 = vector.extract_strided_slice %1 {offsets = [0, 0, 4], sizes = [8, 8, 4], strides = [1, 1, 1]} : vector<8x8x16xf32> to vector<8x8x4xf32>
    %c1_i32 = arith.constant 1 : i32
    %20 = tpu.dynamic_rotate %19 by %c1_i32 dim 1 : vector<8x8x4xf32>, i32 -> vector<8x8x4xf32>
    %21 = tpu.iota {dimensions = array<i32: 1>} : vector<8x8x4xi32>
    %c0_i32_11 = arith.constant 0 : i32
    %22 = vector.broadcast %c0_i32_11 : i32 to vector<8x8x4xi32>
    %23 = arith.cmpi eq, %21, %22 : vector<8x8x4xi32>
    %cst_12 = arith.constant 0.000000e+00 : f32
    %24 = vector.broadcast %cst_12 : f32 to vector<8x8x4xf32>
    %25 = arith.select %23, %24, %20 : vector<8x8x4xi1>, vector<8x8x4xf32>
    %26 = vector.shape_cast %25 : vector<8x8x4xf32> to vector<64x4xf32>
    %c24 = arith.constant 24 : index
    %c0_13 = arith.constant 0 : index
    %27 = vector.load %arg4[%c24, %c0_13] : memref<36x4xf32, #tpu.memory_space<vmem>>, vector<4x4xf32>
    %cst_14 = arith.constant dense<0.000000e+00> : vector<64x4xf32>
    %28 = tpu.matmul %26, %27, %cst_14 {dimension_numbers = #tpu.dot_dimension_numbers<[1], [0], [0], [1], [0, 0, 1, 1], [], []>} : vector<64x4xf32>, vector<4x4xf32>, vector<64x4xf32> -> vector<64x4xf32>
    %29 = arith.addf %18, %28 : vector<64x4xf32>
    %30 = vector.extract_strided_slice %1 {offsets = [0, 0, 12], sizes = [8, 8, 4], strides = [1, 1, 1]} : vector<8x8x16xf32> to vector<8x8x4xf32>
    %c1_i32_15 = arith.constant 1 : i32
    %31 = tpu.dynamic_rotate %30 by %c1_i32_15 dim 1 : vector<8x8x4xf32>, i32 -> vector<8x8x4xf32>
    %32 = tpu.iota {dimensions = array<i32: 1>} : vector<8x8x4xi32>
    %c0_i32_16 = arith.constant 0 : i32
    %33 = vector.broadcast %c0_i32_16 : i32 to vector<8x8x4xi32>
    %34 = arith.cmpi eq, %32, %33 : vector<8x8x4xi32>
    %cst_17 = arith.constant 0.000000e+00 : f32
    %35 = vector.broadcast %cst_17 : f32 to vector<8x8x4xf32>
    %36 = arith.select %34, %35, %31 : vector<8x8x4xi1>, vector<8x8x4xf32>
    %37 = vector.shape_cast %36 : vector<8x8x4xf32> to vector<64x4xf32>
    %c28 = arith.constant 28 : index
    %c0_18 = arith.constant 0 : index
    %38 = vector.load %arg4[%c28, %c0_18] : memref<36x4xf32, #tpu.memory_space<vmem>>, vector<4x4xf32>
    %cst_19 = arith.constant dense<0.000000e+00> : vector<64x4xf32>
    %39 = tpu.matmul %37, %38, %cst_19 {dimension_numbers = #tpu.dot_dimension_numbers<[1], [0], [0], [1], [0, 0, 1, 1], [], []>} : vector<64x4xf32>, vector<4x4xf32>, vector<64x4xf32> -> vector<64x4xf32>
    %40 = arith.addf %29, %39 : vector<64x4xf32>
    %41 = vector.extract_strided_slice %11 {offsets = [0, 0, 4], sizes = [8, 8, 4], strides = [1, 1, 1]} : vector<8x8x8xf32> to vector<8x8x4xf32>
    %c1_i32_20 = arith.constant 1 : i32
    %42 = tpu.dynamic_rotate %41 by %c1_i32_20 dim 1 : vector<8x8x4xf32>, i32 -> vector<8x8x4xf32>
    %43 = tpu.iota {dimensions = array<i32: 1>} : vector<8x8x4xi32>
    %c0_i32_21 = arith.constant 0 : i32
    %44 = vector.broadcast %c0_i32_21 : i32 to vector<8x8x4xi32>
    %45 = arith.cmpi eq, %43, %44 : vector<8x8x4xi32>
    %cst_22 = arith.constant 0.000000e+00 : f32
    %46 = vector.broadcast %cst_22 : f32 to vector<8x8x4xf32>
    %47 = arith.select %45, %46, %42 : vector<8x8x4xi1>, vector<8x8x4xf32>
    %48 = vector.shape_cast %47 : vector<8x8x4xf32> to vector<64x4xf32>
    %c32 = arith.constant 32 : index
    %c0_23 = arith.constant 0 : index
    %49 = vector.load %arg4[%c32, %c0_23] : memref<36x4xf32, #tpu.memory_space<vmem>>, vector<4x4xf32>
    %cst_24 = arith.constant dense<0.000000e+00> : vector<64x4xf32>
    %50 = tpu.matmul %48, %49, %cst_24 {dimension_numbers = #tpu.dot_dimension_numbers<[1], [0], [0], [1], [0, 0, 1, 1], [], []>} : vector<64x4xf32>, vector<4x4xf32>, vector<64x4xf32> -> vector<64x4xf32>
    %51 = arith.addf %40, %50 : vector<64x4xf32>
    %c0_25 = arith.constant 0 : index
    %c0_26 = arith.constant 0 : index
    %52 = vector.load %arg5[%c0_25, %c0_26] : memref<1x4xf32, #tpu.memory_space<vmem>>, vector<1x4xf32>
    %53 = vector.broadcast %52 : vector<1x4xf32> to vector<64x4xf32>
    %54 = arith.addf %51, %53 : vector<64x4xf32>
    %55 = vector.shape_cast %54 : vector<64x4xf32> to vector<1x8x8x4xf32>
    %c0_27 = arith.constant 0 : index
    %c0_28 = arith.constant 0 : index
    %c0_29 = arith.constant 0 : index
    %c0_30 = arith.constant 0 : index
    %56 = vector.load %arg6[%c0_27, %c0_28, %c0_29, %c0_30] : memref<1x8x8x4xf32, #tpu.memory_space<vmem>>, vector<1x8x8x4xf32>
    tpu.vector_store %arg6[%c0_27, %c0_28, %c0_29, %c0_30], %55 {strides = array<i32>} : memref<1x8x8x4xf32, #tpu.memory_space<vmem>>, vector<1x8x8x4xf32>,
    return
  }
  func.func @transform_0(%arg0: i32, %arg1: i32) -> (i32, i32, i32, i32) {
    %c0_i32 = arith.constant 0 : i32
    %c0_i32_0 = arith.constant 0 : i32
    %c0_i32_1 = arith.constant 0 : i32
    return %arg0, %arg1, %c0_i32, %c0_i32_0 : i32, i32, i32, i32
  }
  func.func @transform_1(%arg0: i32, %arg1: i32) -> (i32, i32, i32, i32) {
    %c8_i32 = arith.constant 8 : i32
    %0 = arith.muli %arg1, %c8_i32 : i32
    %c1_i32 = arith.constant 1 : i32
    %1 = arith.subi %0, %c1_i32 : i32
    %c0_i32 = arith.constant 0 : i32
    %2 = arith.maxsi %1, %c0_i32 : i32
    %c0_i32_0 = arith.constant 0 : i32
    %c0_i32_1 = arith.constant 0 : i32
    %c0_i32_2 = arith.constant 0 : i32
    return %arg0, %2, %c0_i32_0, %c0_i32_1 : i32, i32, i32, i32
  }
  func.func @transform_2(%arg0: i32, %arg1: i32) -> (i32, i32) {
    %c0_i32 = arith.constant 0 : i32
    %c0_i32_0 = arith.constant 0 : i32
    %c0_i32_1 = arith.constant 0 : i32
    return %c0_i32, %c0_i32_0 : i32, i32
  }
  func.func @transform_3(%arg0: i32, %arg1: i32) -> (i32, i32) {
    %c0_i32 = arith.constant 0 : i32
    %c0_i32_0 = arith.constant 0 : i32
    %c0_i32_1 = arith.constant 0 : i32
    return %c0_i32, %c0_i32_0 : i32, i32
  }
  func.func @transform_4(%arg0: i32, %arg1: i32) -> (i32, i32, i32, i32) {
    %c0_i32 = arith.constant 0 : i32
    %c0_i32_0 = arith.constant 0 : i32
    %c0_i32_1 = arith.constant 0 : i32
    return %arg0, %arg1, %c0_i32, %c0_i32_0 : i32, i32, i32, i32
  }
}

</mosaic_0001>

<bundles_post_ra>
// kernel: downsample_forward.1
= control target key start
LH: loop header
LB: loop body
LE: loop exit
PB: predicated region body
PF: predicated region fallthrough
CT: control target
= control target key end

     0   :  { %s1021_s15 = smov 0   ;;  %s1023_s16 = smov 0   ;;  %s1251_s0 = inlined_call_operand.vmem [shape: f32[2,8,8,16], index: 0, kind: input, shape index: {}, may-alias: {0,1}]   ;;  %s1252_s1 = inlined_call_operand.vmem [shape: f32[2,8,8,16], index: 1, kind: input, shape index: {}, may-alias: {0,1}]   ;;  %s1253_s2 = inlined_call_operand.vmem [shape: f32[36,4], index: 2, kind: input, shape index: {}]   ;;  %s1254_s3 = inlined_call_operand.vmem [shape: f32[1,4], index: 3, kind: input, shape index: {}]   ;;  %s1255_s4 = inlined_call_operand.vmem [shape: f32[2,8,8,4], index: 4, kind: output, shape index: {}]  }
   0x1   :  { %s1025_s17 = smov 0  }
   0x2 LB: > { %s26_s18 = sadd.s32 1, %s987_s16  ;;  %p883_p0 = scmp.ge.s32.totalorder %s991_s17, 1  ;;  %s991_s17 = sphi %s1025_s17, %s14_s17   ;;  %s987_s16 = sphi %s1023_s16, %s1257_s16   ;;  %s983_s15 = sphi %s1021_s15, %s1256_s15  }
   0x3   : > { %p28_p1 = scmp.ge.s32.totalorder %s26_s18, 2  ;;  %p214_p2 = scmp.lt.s32.totalorder %s991_s17, 3 }
   0x5   : > { %s1259_s18 = smov (%p28_p1, %s26_s18), 0  ;;  %p215_p3 = pnand %p883_p0, %p214_p2 }
   0x6   : > { %p261_p4 = scmp.lt.s32.totalorder (!%p215_p3), %s983_s15, 1  ;;  %s993_s23 = smov (!%p215_p3), 120  }
   0x7   : > { %218 = sbr.rel (%p215_p3) target bundleno = 353 (0x161), region = 36  ;;  %s994_s27 = smov (!%p215_p3), 124  }
   0x8   : > { %s995_s28 = smov (!%p215_p3), 116  }
   0xc   : > { %s1261_s15 = smov (!%p261_p4, %s983_s15), 1  ;;  %v312_v9 = vld [vmem:[%s1253_s2 + $0x10] sm:$0xff]  ;;  %v497_v11 = vld [vmem:[%s1253_s2 + $0x18] sm:$0xf]  ;;  %vm523_vm0 = vcmask 1043456   ;;  %v311_v13 = vld [vmem:[%s1253_s2 + $0x8] sm:$0xff]  ;;  %v486_v22 = vlaneseq }
   0xd   : > { %s1039_s19 = sshll.u32 %s1261_s15, 6  ;;  %939 = vmatpush.msra.mxu2 %v312_v9  ;;  %938 = vmatpush.msra.mxu1 %v312_v9  ;;  %v616_v12 = vld [vmem:[%s1253_s2 + $0x1c] sm:$0xf]  ;;  %vm337_vm1 = vcmask 64512   ;;  %v698_v16 = vld [vmem:[%s1253_s2 + $0x20] sm:$0xf] }
   0xe   : > { %s1045_s22 = scalar_lea.vmem %s1251_s0, %s1039_s19  ;;  %s281_s26 = scalar_lea.vmem %s1252_s1, %s1039_s19  ;;  %940 = vmatpush.msra.mxu3 %v312_v9  ;;  %369 = vmatpush.msra.mxu0 %v312_v9  ;;  %v310_v17 = vld [vmem:[%s1253_s2] sm:$0xff]  ;;  %v1121_v24 = vshrl.u32 %v486_v22, 7  ;;  %vm498_vm3 = vcmask 31744   ;;  %vm395_vm4 = vcmask 130048  }
   0xf   : > { %v1048_v0 = vld [vmem:[%s1045_s22 + $0x18] sm:$0xff]  ;;  %v1051_v1 = vld [vmem:[%s1045_s22 + $0x8] sm:$0xff]  ;;  %v1056_v2 = vld [vmem:[%s1045_s22 + $0x30] sm:$0xff]  ;;  %906 = vmatpush.msk.msrb.mxu2 %vm523_vm0, %v497_v11  ;;  %427 = vmatpush.msrb.mxu1 %v311_v13 }
  0x10   : > { %329 = vrot.lane.b32.xlu0 %v1048_v0, %s993_s23  ;;  %325 = vrot.lane.b32.xlu1 %v1051_v1, %s993_s23  ;;  %v1064_v3 = vld [vmem:[%s1045_s22 + $0x28] sm:$0xff]  ;;  %v1067_v4 = vld [vmem:[%s1045_s22 + $0x20] sm:$0xff]  ;;  %vm488_vm2 = vcmp.eq.s32.totalorder %v1121_v24, 0 }
  0x11   : > { %335 = vrot.lane.b32.xlu2 %v1056_v2, %s993_s23  ;;  %v304_v5 = vld [vmem:[%s281_s26] sm:$0xff]  ;;  %v1072_v7 = vld [vmem:[%s1045_s22 + $0x10] sm:$0xff]  ;;  %v1097_v10 = vld [vmem:[%s1045_s22 + $0x38] sm:$0xff]  ;;  %915 = vmatpush.msk.msrb.mxu3 %vm523_vm0, %v616_v12 }
  0x12   : > { %v309_v6 = vmul.f32 0.0, %v304_v5  ;;  %v1075_v8 = vld [vmem:[%s1045_s22] sm:$0xff]  ;;  %924 = vmatpush.msk.msrb.mxu0 %vm523_vm0, %v698_v16  ;;  %428 = vmatpush.msrb.mxu1 %v310_v17 }
  0x18   : > { %333 = vrot.lane.b32.xlu0 %v1064_v3, %s993_s23  ;;  %331 = vrot.lane.b32.xlu1 %v1067_v4, %s993_s23 }
  0x19   : > { %321 = vrot.lane.b32.xlu2 %v309_v6, %s993_s23 }
  0x20   : > { %327 = vrot.lane.b32.xlu0 %v1072_v7, %s993_s23  ;;  %454 = vrot.lane.b32.xlu1 %v1075_v8, %s994_s27 }
  0x21   : > { %576 = vrot.lane.b32.xlu2 %v1075_v8, %s995_s28 }
  0x28   : > { %323 = vrot.lane.b32.xlu0 %v1075_v8, %s993_s23  ;;  %456 = vrot.lane.b32.xlu1 %v1051_v1, %s994_s27  ;;  %s1214_s23 = scalar_lea.vmem %s1255_s4, %s1039_s19 }
  0x29   : > { %578 = vrot.lane.b32.xlu2 %v1051_v1, %s995_s28 }
  0x30   : > { %693 = vrot.lane.b32.xlu0 %v309_v6, %s995_s28  ;;  %458 = vrot.lane.b32.xlu1 %v1072_v7, %s994_s27 }
  0x31   : > { %580 = vrot.lane.b32.xlu2 %v1072_v7, %s995_s28 }
  0x38   : > { %460 = vrot.lane.b32.xlu0 %v1048_v0, %s994_s27  ;;  %582 = vrot.lane.b32.xlu1 %v1048_v0, %s995_s28 }
  0x39   : > { %462 = vrot.lane.b32.xlu2 %v1067_v4, %s994_s27 }
  0x40   : > { %584 = vrot.lane.b32.xlu0 %v1067_v4, %s995_s28  ;;  %464 = vrot.lane.b32.xlu1 %v1064_v3, %s994_s27 }
  0x41   : > { %586 = vrot.lane.b32.xlu2 %v1064_v3, %s995_s28 }
  0x48   : > { %466 = vrot.lane.b32.xlu0 %v1056_v2, %s994_s27  ;;  %588 = vrot.lane.b32.xlu1 %v1056_v2, %s995_s28 }
  0x49   : > { %468 = vrot.lane.b32.xlu2 %v1097_v10, %s994_s27 }
  0x50   : > { %590 = vrot.lane.b32.xlu0 %v1097_v10, %s995_s28 }
  0x6b   : > { %v336_v14 = vpop.permute.xlu2 %335 }
  0x73   : > { %v322_v15 = vpop.permute.xlu2 %321 }
  0x74   : > { %890 = vmatmul.msk.f32.vlgmr.msra.gmra.mxu0 %vm337_vm1, %v322_v15 }
  0x7b   : > { %v577_v23 = vpop.permute.xlu2 %576 }
  0x7c   : > { %v600_v28 = vrot.slane %v577_v23, 7 }
  0x7e   : > { %v608_v31 = vsel %vm488_vm2, 0.0, %v600_v28 }
  0x82   : > { %v330_v18 = vpop.permute.xlu0 %329  ;;  %v326_v19 = vpop.permute.xlu1 %325 }
  0x83   : > { %894 = vmatmul.msk.f32.vlgmr.msra.gmra.mxu2 %vm337_vm1, %v330_v18  ;;  %892 = vmatmul.msk.f32.vlgmr.msra.gmra.mxu1 %vm337_vm1, %v326_v19  ;;  %v579_v30 = vpop.permute.xlu2 %578 }
  0x84   : > { %v601_v35 = vrot.slane %v579_v30, 7 }
  0x86   : > { %v609_v37 = vsel %vm488_vm2, 0.0, %v601_v35 }
  0x8a   : > { %v334_v20 = vpop.permute.xlu0 %333  ;;  %v332_v21 = vpop.permute.xlu1 %331 }
  0x8b   : > { %896 = vmatmul.msk.f32.vlgmr.msra.gmra.mxu3 %vm337_vm1, %v334_v20  ;;  %895 = vmatmul.msk.f32.gmra.mxu2 %vm337_vm1, %v332_v21  ;;  %v581_v38 = vpop.permute.xlu2 %580 }
  0x8c   : > { %v602_v43 = vrot.slane %v581_v38, 7 }
  0x8e   : > { %v610_v46 = vsel %vm488_vm2, 0.0, %v602_v43 }
  0x92   : > { %v328_v25 = vpop.permute.xlu0 %327  ;;  %v455_v26 = vpop.permute.xlu1 %454 }
  0x93   : > { %893 = vmatmul.msk.f32.gmra.mxu1 %vm337_vm1, %v328_v25  ;;  %897 = vmatmul.msk.f32.gmra.mxu3 %vm337_vm1, %v336_v14  ;;  %v478_v27 = vrot.slane %v455_v26, 7  ;;  %v463_v51 = vpop.permute.xlu2 %462 }
  0x94   : > { %v482_v53 = vrot.slane %v463_v51, 7 }
  0x95   : > { %v489_v29 = vsel %vm488_vm2, 0.0, %v478_v27 }
  0x96   : > { %907 = vmatmul.msk.f32.vlgmr.msrb.gmra.mxu2 %vm498_vm3, %v489_v29  ;;  %v493_v56 = vsel %vm488_vm2, 0.0, %v482_v53  ;;  %v1208_v29 = vld [vmem:[%s1254_s3] ss:$0 sm:$0xff] }
  0x9a   : > { %v324_v32 = vpop.permute.xlu0 %323  ;;  %v457_v33 = vpop.permute.xlu1 %456 }
  0x9b   : > { %891 = vmatmul.msk.f32.gmra.mxu0 %vm337_vm1, %v324_v32  ;;  %916 = vmatmul.msk.f32.vlgmr.msrb.gmra.mxu3 %vm498_vm3, %v608_v31  ;;  %v479_v34 = vrot.slane %v457_v33, 7  ;;  %v587_v61 = vpop.permute.xlu2 %586 }
  0x9c   : > { %898 = vmatmul.msk.f32.vlgmr.msrb.gmra.mxu1 %vm395_vm4, %v1075_v8  ;;  %v605_v63 = vrot.slane %v587_v61, 7 }
  0x9d   : > { %v490_v36 = vsel %vm488_vm2, 0.0, %v479_v34 }
  0x9e   : > { %908 = vmatmul.msk.f32.gmra.mxu2 %vm498_vm3, %v490_v36  ;;  %v613_v5 = vsel %vm488_vm2, 0.0, %v605_v63 }
  0xa2   : > { %v694_v39 = vpop.permute.xlu0 %693  ;;  %v459_v40 = vpop.permute.xlu1 %458 }
  0xa3   : > { %v696_v41 = vrot.slane %v694_v39, 7  ;;  %917 = vmatmul.msk.f32.gmra.mxu3 %vm498_vm3, %v609_v37  ;;  %v480_v42 = vrot.slane %v459_v40, 7  ;;  %v469_v8 = vpop.permute.xlu2 %468 }
  0xa4   : > { %899 = vmatmul.msk.f32.gmra.mxu1 %vm395_vm4, %v1051_v1  ;;  %v485_v9 = vrot.slane %v469_v8, 7 }
  0xa5   : > { %v697_v44 = vsel %vm488_vm2, 0.0, %v696_v41  ;;  %v491_v45 = vsel %vm488_vm2, 0.0, %v480_v42 }
  0xa6   : > { %925 = vmatmul.msk.f32.vlgmr.msrb.gmra.mxu0 %vm498_vm3, %v697_v44  ;;  %909 = vmatmul.msk.f32.gmra.mxu2 %vm498_vm3, %v491_v45  ;;  %v496_v13 = vsel %vm488_vm2, 0.0, %v485_v9 }
  0xaa   : > { %v461_v47 = vpop.permute.xlu0 %460  ;;  %v583_v48 = vpop.permute.xlu1 %582 }
  0xab   : > { %v481_v49 = vrot.slane %v461_v47, 7  ;;  %918 = vmatmul.msk.f32.gmra.mxu3 %vm498_vm3, %v610_v46  ;;  %v603_v50 = vrot.slane %v583_v48, 7 }
  0xac   : > { %900 = vmatmul.msk.f32.gmra.mxu1 %vm395_vm4, %v1072_v7 }
  0xad   : > { %v492_v52 = vsel %vm488_vm2, 0.0, %v481_v49  ;;  %v611_v54 = vsel %vm488_vm2, 0.0, %v603_v50 }
  0xae   : > { %926 = vmatmul.msk.f32.gmra.mxu0 %vm498_vm3, %v608_v31  ;;  %910 = vmatmul.msk.f32.gmra.mxu2 %vm498_vm3, %v492_v52 }
  0xb2   : > { %v585_v55 = vpop.permute.xlu0 %584  ;;  %v465_v58 = vpop.permute.xlu1 %464 }
  0xb3   : > { %919 = vmatmul.msk.f32.gmra.mxu3 %vm498_vm3, %v611_v54  ;;  %v604_v57 = vrot.slane %v585_v55, 7  ;;  %v483_v59 = vrot.slane %v465_v58, 7 }
  0xb4   : > { %901 = vmatmul.msk.f32.gmra.mxu1 %vm395_vm4, %v1048_v0 }
  0xb5   : > { %v612_v60 = vsel %vm488_vm2, 0.0, %v604_v57  ;;  %v494_v62 = vsel %vm488_vm2, 0.0, %v483_v59 }
  0xb6   : > { %927 = vmatmul.msk.f32.gmra.mxu0 %vm498_vm3, %v609_v37  ;;  %911 = vmatmul.msk.f32.gmra.mxu2 %vm498_vm3, %v493_v56 }
  0xba   : > { %v467_v0 = vpop.permute.xlu0 %466  ;;  %v589_v6 = vpop.permute.xlu1 %588 }
  0xbb   : > { %920 = vmatmul.msk.f32.gmra.mxu3 %vm498_vm3, %v612_v60  ;;  %v484_v1 = vrot.slane %v467_v0, 7 }
  0xbc   : > { %902 = vmatmul.msk.f32.gmra.mxu1 %vm395_vm4, %v1067_v4  ;;  %v606_v4 = vrot.slane %v589_v6, 7 }
  0xbd   : > { %v495_v7 = vsel %vm488_vm2, 0.0, %v484_v1 }
  0xbe   : > { %928 = vmatmul.msk.f32.gmra.mxu0 %vm498_vm3, %v610_v46  ;;  %912 = vmatmul.msk.f32.gmra.mxu2 %vm498_vm3, %v494_v62  ;;  %v614_v11 = vsel %vm488_vm2, 0.0, %v606_v4 }
  0xc2   : > { %v591_v12 = vpop.permute.xlu0 %590 }
  0xc3   : > { %921 = vmatmul.msk.f32.gmra.mxu3 %vm498_vm3, %v613_v5 }
  0xc4   : > { %903 = vmatmul.msk.f32.gmra.mxu1 %vm395_vm4, %v1064_v3  ;;  %v607_v3 = vrot.slane %v591_v12, 7 }
  0xc6   : > { %929 = vmatmul.msk.f32.gmra.mxu0 %vm498_vm3, %v611_v54  ;;  %913 = vmatmul.msk.f32.gmra.mxu2 %vm498_vm3, %v495_v7  ;;  %v615_v14 = vsel %vm488_vm2, 0.0, %v607_v3 }
  0xcb   : > { %922 = vmatmul.msk.f32.gmra.mxu3 %vm498_vm3, %v614_v11 }
  0xcc   : > { %904 = vmatmul.msk.f32.gmra.mxu1 %vm395_vm4, %v1056_v2 }
  0xce   : > { %930 = vmatmul.msk.f32.gmra.mxu0 %vm498_vm3, %v612_v60  ;;  %914 = vmatmul.msk.f32.gmra.mxu2 %vm498_vm3, %v496_v13 }
  0xd3   : > { %923 = vmatmul.msk.f32.gmra.mxu3 %vm498_vm3, %v615_v14 }
  0xd4   : > { %905 = vmatmul.msk.f32.gmra.mxu1 %vm395_vm4, %v1097_v10 }
  0xd6   : > { %931 = vmatmul.msk.f32.gmra.mxu0 %vm498_vm3, %v613_v5 }
  0xde   : > { %932 = vmatmul.msk.f32.gmra.mxu0 %vm498_vm3, %v614_v11 }
  0xf1   : > { %v371_v19 = vpop.f32.mrf.mxu0 }
 0x100   : > { %v377_v16 = vpop.f32.mrf.mxu1 }
 0x106   : > { %v383_v15 = vpop.f32.mrf.mxu2 }
 0x10e   : > { %v1201_v2 = vpop.f32.mrf.mxu3  ;;  %v386_v17 = vpop.f32.mrf.mxu2 }
 0x110   : > { %v380_v18 = vpop.f32.mrf.mxu1 }
 0x116   : > { %v1203_v20 = vpop.f32.mrf.mxu3 }
 0x118   : > { %v374_v23 = vpop.f32.mrf.mxu0 }
 0x119   : > { %v430_v21 = vpop.f32.mrf.mxu1  ;;  %v544_v22 = vpop.f32.mrf.mxu2 }
 0x11a   : > { %v431_v24 = vadd.f32 %v430_v21, %v371_v19 }
 0x11c   : > { %v568_v10 = vadd.f32 %v544_v22, %v431_v24 }
 0x11e   : > { %v661_v25 = vpop.f32.mrf.mxu3 }
 0x11f   : > { %v685_v28 = vadd.f32 %v661_v25, %v568_v10 }
 0x121   : > { %v433_v26 = vpop.f32.mrf.mxu1  ;;  %v547_v27 = vpop.f32.mrf.mxu2 }
 0x122   : > { %v434_v31 = vadd.f32 %v433_v26, %v374_v23 }
 0x123   : > { %v722_v30 = vpop.f32.mrf.mxu0 }
 0x124   : > { %v746_v32 = vadd.f32 %v722_v30, %v685_v28  ;;  %v569_v35 = vadd.f32 %v547_v27, %v434_v31 }
 0x126   : > { %v758_v33 = vadd.f32 %v1208_v29, %v746_v32  ;;  %v664_v34 = vpop.f32.mrf.mxu3 }
 0x127   : > { %v686_v38 = vadd.f32 %v664_v34, %v569_v35 }
 0x128   : > { %766 = vst.msk [vmem:[%s1214_s23] sm:$0xff] %vm498_vm3, %v758_v33 }
 0x129   : > { %v436_v36 = vpop.f32.mrf.mxu1  ;;  %v550_v37 = vpop.f32.mrf.mxu2 }
 0x12a   : > { %v437_v40 = vadd.f32 %v436_v36, %v377_v16 }
 0x12b   : > { %v725_v39 = vpop.f32.mrf.mxu0 }
 0x12c   : > { %v747_v41 = vadd.f32 %v725_v39, %v686_v38  ;;  %v570_v44 = vadd.f32 %v550_v37, %v437_v40 }
 0x12e   : > { %v759_v42 = vadd.f32 %v1208_v29, %v747_v41  ;;  %v667_v43 = vpop.f32.mrf.mxu3 }
 0x12f   : > { %v687_v47 = vadd.f32 %v667_v43, %v570_v44 }
 0x130   : > { %767 = vst.msk [vmem:[%s1214_s23 + $0x8] sm:$0xff] %vm498_vm3, %v759_v42 }
 0x131   : > { %v439_v45 = vpop.f32.mrf.mxu1  ;;  %v553_v46 = vpop.f32.mrf.mxu2 }
 0x132   : > { %v440_v49 = vadd.f32 %v439_v45, %v380_v18 }
 0x133   : > { %v728_v48 = vpop.f32.mrf.mxu0 }
 0x134   : > { %v748_v50 = vadd.f32 %v728_v48, %v687_v47  ;;  %v571_v53 = vadd.f32 %v553_v46, %v440_v49 }
 0x136   : > { %v760_v51 = vadd.f32 %v1208_v29, %v748_v50  ;;  %v670_v52 = vpop.f32.mrf.mxu3 }
 0x137   : > { %v688_v56 = vadd.f32 %v670_v52, %v571_v53 }
 0x138   : > { %768 = vst.msk [vmem:[%s1214_s23 + $0x10] sm:$0xff] %vm498_vm3, %v760_v51 }
 0x139   : > { %v442_v54 = vpop.f32.mrf.mxu1  ;;  %v556_v55 = vpop.f32.mrf.mxu2 }
 0x13a   : > { %v443_v58 = vadd.f32 %v442_v54, %v383_v15 }
 0x13b   : > { %v731_v57 = vpop.f32.mrf.mxu0 }
 0x13c   : > { %v749_v59 = vadd.f32 %v731_v57, %v688_v56  ;;  %v572_v62 = vadd.f32 %v556_v55, %v443_v58 }
 0x13e   : > { %v761_v60 = vadd.f32 %v1208_v29, %v749_v59  ;;  %v673_v61 = vpop.f32.mrf.mxu3 }
 0x13f   : > { %v689_v1 = vadd.f32 %v673_v61, %v572_v62 }
 0x140   : > { %769 = vst.msk [vmem:[%s1214_s23 + $0x18] sm:$0xff] %vm498_vm3, %v761_v60 }
 0x141   : > { %v445_v63 = vpop.f32.mrf.mxu1  ;;  %v559_v0 = vpop.f32.mrf.mxu2 }
 0x142   : > { %v446_v6 = vadd.f32 %v445_v63, %v386_v17 }
 0x143   : > { %v734_v5 = vpop.f32.mrf.mxu0 }
 0x144   : > { %v750_v7 = vadd.f32 %v734_v5, %v689_v1  ;;  %v573_v9 = vadd.f32 %v559_v0, %v446_v6 }
 0x146   : > { %v762_v4 = vadd.f32 %v1208_v29, %v750_v7  ;;  %v676_v8 = vpop.f32.mrf.mxu3 }
 0x147   : > { %v690_v12 = vadd.f32 %v676_v8, %v573_v9 }
 0x148   : > { %770 = vst.msk [vmem:[%s1214_s23 + $0x20] sm:$0xff] %vm498_vm3, %v762_v4 }
 0x149   : > { %v448_v11 = vpop.f32.mrf.mxu1  ;;  %v562_v13 = vpop.f32.mrf.mxu2 }
 0x14a   : > { %v449_v14 = vadd.f32 %v448_v11, %v1201_v2 }
 0x14b   : > { %v737_v3 = vpop.f32.mrf.mxu0 }
 0x14c   : > { %v751_v15 = vadd.f32 %v737_v3, %v690_v12  ;;  %v574_v19 = vadd.f32 %v562_v13, %v449_v14 }
 0x14e   : > { %v763_v16 = vadd.f32 %v1208_v29, %v751_v15  ;;  %v679_v18 = vpop.f32.mrf.mxu3 }
 0x14f   : > { %v691_v21 = vadd.f32 %v679_v18, %v574_v19 }
 0x150   : > { %771 = vst.msk [vmem:[%s1214_s23 + $0x28] sm:$0xff] %vm498_vm3, %v763_v16 }
 0x151   : > { %v451_v17 = vpop.f32.mrf.mxu1  ;;  %v565_v25 = vpop.f32.mrf.mxu2 }
 0x152   : > { %v452_v23 = vadd.f32 %v451_v17, %v1203_v20 }
 0x153   : > { %v740_v22 = vpop.f32.mrf.mxu0 }
 0x154   : > { %v752_v24 = vadd.f32 %v740_v22, %v691_v21  ;;  %v575_v27 = vadd.f32 %v565_v25, %v452_v23 }
 0x156   : > { %v764_v10 = vadd.f32 %v1208_v29, %v752_v24  ;;  %v682_v26 = vpop.f32.mrf.mxu3 }
 0x157   : > { %v692_v2 = vadd.f32 %v682_v26, %v575_v27 }
 0x158   : > { %772 = vst.msk [vmem:[%s1214_s23 + $0x30] sm:$0xff] %vm498_vm3, %v764_v10 }
 0x15b   : > { %v743_v28 = vpop.f32.mrf.mxu0 }
 0x15c   : > { %v753_v30 = vadd.f32 %v743_v28, %v692_v2 }
 0x15e   : > { %v765_v31 = vadd.f32 %v1208_v29, %v753_v30 }
 0x160   : > { %773 = vst.msk [vmem:[%s1214_s23 + $0x38] sm:$0xff] %vm498_vm3, %v765_v31 }
 0x161 PF: > { %s14_s17 = sadd.s32 1, %s991_s17   ;;  %s1256_s15 = smov %s987_s16 }
 0x162   : > { %p11_p5 = scmp.ge.s32.totalorder %s14_s17, 4   ;;  %s1257_s16 = smov %s1259_s18 }
 0x164   :  { %13 = sbr.rel (!%p11_p5) target bundleno = 2 (0x2), region = 69 }

</bundles_post_ra>
